<compile_context>
chip_gen: v7x
topology: tpu7x:2x2x1
jax: 0.10.0
libtpu: 0.0.40
codegen_flags: <defaults>
</compile_context>

<pallas_src>
import functools

import jax
import jax.numpy as jnp
from jax.experimental import pallas as pl
from jax.experimental.pallas import tpu as pltpu


def _gcn_kernel(x_ref, adj_ref, p_ref, o_ref, *, F, H1, H2, H3):
    """Fused 3-layer GCN forward for one batch block.

    x_ref:   (TB*N, F)              node features, batch folded into rows
    adj_ref: (TB*N, TB*N)           block-diagonal kron(I_TB, adj)
    p_ref:   (F+H1+H2+1, H1+H2+H3)  block-diag W1/W2/W3 + trailing bias row
    o_ref:   (TB*N, H3)             pre-flatten output (reshaped in wrapper)
    """
    adj = adj_ref[...]
    slab = p_ref[...]

    # Static slices of the fused parameter slab (one-time, tiny).
    w1 = slab[0:F, 0:H1]
    w2 = slab[F:F + H1, H1:H1 + H2]
    w3 = slab[F + H1:F + H1 + H2, H1 + H2:H1 + H2 + H3]
    brow = slab[F + H1 + H2:F + H1 + H2 + 1, :]
    b1 = brow[:, 0:H1].astype(jnp.float32)
    b2 = brow[:, H1:H1 + H2].astype(jnp.float32)
    b3 = brow[:, H1 + H2:H1 + H2 + H3].astype(jnp.float32)

    def layer(h, w, b):
        # relu(A_bd @ (h @ W) + b), entirely in the (TB*N, H) layout:
        # two MXU matmuls + VPU add/relu, no relayouts.
        xw = jnp.dot(h.astype(w.dtype), w, preferred_element_type=jnp.float32)
        y = jnp.dot(adj, xw.astype(adj.dtype),
                    preferred_element_type=jnp.float32)
        return jnp.maximum(y + b, 0.0)

    h = layer(x_ref[...], w1, b1)
    h = layer(h, w2, b2)
    o_ref[...] = layer(h, w3, b3).astype(o_ref.dtype)


def gcn_forward(x, adj, params, *, batch_block=None,
                compute_dtype=jnp.float32):
    """x: (B, N, F) f32, adj: (N, N) f32. Returns (B, N * H3) f32."""
    (w1, b1), (w2, b2), (w3, b3) = params
    B, N, F = x.shape
    H1, H2, H3 = w1.shape[1], w2.shape[1], w3.shape[1]

    if batch_block is None:
        batch_block = B                       # one grid step: minimal overhead
    assert B % batch_block == 0
    TB = batch_block
    num_blocks = B // TB
    if num_blocks > 1:
        # Sublane-tiling constraint on the x / output blocks when tiled.
        assert (TB * N) % 8 == 0, \
            "need batch_block * num_joint % 8 == 0 (or batch_block = B)"
    # Block-diag adjacency scales as (TB*N)^2 * 4B; keep it small in VMEM
    # (sized against v7x's 64 MiB physical / 32 MiB scoped default).
    assert TB * N <= 2048, "shrink batch_block: block-diag adjacency too big"

    # Batch folded into the matmul M dimension (free XLA reshape).
    x2d = x.reshape(B * N, F).astype(compute_dtype)

    # Block-diagonal adjacency so every layer stays in (TB*N, H) layout.
    a_bd = jnp.kron(jnp.eye(TB, dtype=compute_dtype),
                    adj.astype(compute_dtype))

    # Fuse all weights + biases into one zero-padded slab (3 inputs total).
    P_ROWS, P_COLS = F + H1 + H2 + 1, H1 + H2 + H3
    slab = jnp.zeros((P_ROWS, P_COLS), compute_dtype)
    slab = slab.at[0:F, 0:H1].set(w1.astype(compute_dtype))
    slab = slab.at[F:F + H1, H1:H1 + H2].set(w2.astype(compute_dtype))
    slab = slab.at[F + H1:F + H1 + H2, H1 + H2:].set(w3.astype(compute_dtype))
    slab = slab.at[P_ROWS - 1:P_ROWS, 0:H1].set(b1.astype(compute_dtype))
    slab = slab.at[P_ROWS - 1:P_ROWS, H1:H1 + H2].set(b2.astype(compute_dtype))
    slab = slab.at[P_ROWS - 1:P_ROWS, H1 + H2:].set(b3.astype(compute_dtype))

    kernel = functools.partial(_gcn_kernel, F=F, H1=H1, H2=H2, H3=H3)

    out2d = pl.pallas_call(
        kernel,
        out_shape=jax.ShapeDtypeStruct((B * N, H3), jnp.float32),
        grid_spec=pltpu.PrefetchScalarGridSpec(
            num_scalar_prefetch=0,
            grid=(num_blocks,),
            in_specs=[
                pl.BlockSpec((TB * N, F), lambda i: (i, 0)),       # x block
                pl.BlockSpec((TB * N, TB * N), lambda i: (0, 0)),  # A_bd
                pl.BlockSpec((P_ROWS, P_COLS), lambda i: (0, 0)),  # params
            ],
            out_specs=pl.BlockSpec((TB * N, H3), lambda i: (i, 0)),
        ),
        compiler_params=pltpu.CompilerParams(
            dimension_semantics=("parallel",)),
    )(x2d, a_bd, slab)

    # Row-major (B*N, H3) -> (B, N*H3) == torch x.view(B, -1): free in XLA.
    return out2d.reshape(B, N * H3)


def init_gcn_params(key, feature_dim, hidden_dim=32):
    """Deterministic init matching GraphConvolution.reset_parameters:
    uniform(-stdv, stdv) with stdv = 1/sqrt(out_feature)."""
    def layer(k, fin, fout):
        kw, kb = jax.random.split(k)
        stdv = 1.0 / jnp.sqrt(jnp.float32(fout))
        w = jax.random.uniform(kw, (fin, fout), jnp.float32, -stdv, stdv)
        b = jax.random.uniform(kb, (1, fout), jnp.float32, -stdv, stdv)
        return w, b

    k1, k2, k3 = jax.random.split(key, 3)
    p1 = layer(k1, feature_dim, hidden_dim)
    p2 = layer(k2, hidden_dim, hidden_dim)
    p3 = layer(k3, hidden_dim, hidden_dim // 2)
    return (p1, p2, p3)


def gcn_reference(x, adj, params):
    """Pure-JAX reference of the PyTorch forward for verification."""
    h = x
    for (w, b) in params:
        h = jnp.maximum(jnp.einsum('nm,bmf->bnf', adj, h @ w) + b[None], 0.0)
    return h.reshape(x.shape[0], -1)


if __name__ == "__main__":
    # Small shapes consistent with the module:
    # batch=2, num_joint=8, feature_dim=16, hidden_dim=32 (gc3 -> 16).
    B, N, F, H = 2, 8, 16, 32
    key = jax.random.PRNGKey(0)
    kx, kadj, kp = jax.random.split(key, 3)

    x = jax.random.normal(kx, (B, N, F), dtype=jnp.float32)
    # Symmetric normalized-ish adjacency (any dense (N,N) works for the math).
    a = jax.random.uniform(kadj, (N, N), dtype=jnp.float32)
    adj = 0.5 * (a + a.T)

    params = init_gcn_params(kp, F, H)

    out = gcn_forward(x, adj, params)
    out = jax.block_until_ready(out)

    ref = gcn_reference(x, adj, params)
    assert out.shape == (B, N * (H // 2)), out.shape
    assert jnp.allclose(out, ref, atol=1e-5, rtol=1e-5), \
        float(jnp.max(jnp.abs(out - ref)))

    # TODO(synk): dropout is defined in GCN.__init__ but never applied in
    # forward(), so it is intentionally omitted.
    print("KERNEL_OK")
</pallas_src>

<mosaic_0001>
module attributes {stable_mosaic.version = 11 : i64} {
  func.func @_gcn_kernel(%arg0: i32, %arg1: memref<16x16xf32, #tpu.memory_space<vmem>>, %arg2: memref<16x16xf32, #tpu.memory_space<vmem>>, %arg3: memref<81x80xf32, #tpu.memory_space<vmem>>, %arg4: memref<16x16xf32, #tpu.memory_space<vmem>>) attributes {dimension_semantics = [#tpu.dimension_semantics<parallel>], iteration_bounds = array<i64: 1>, scalar_prefetch = 0 : i64, scratch_operands = 0 : i64, tpu.core_type = #tpu.core_type<tc>, window_params = [{transform_indices = @transform_0, window_bounds = array<i64: 16, 16>}, {pipeline_mode = #tpu.pipeline_mode<synchronous>, transform_indices = @transform_1, window_bounds = array<i64: 16, 16>}, {pipeline_mode = #tpu.pipeline_mode<synchronous>, transform_indices = @transform_2, window_bounds = array<i64: 81, 80>}, {transform_indices = @transform_3, window_bounds = array<i64: 16, 16>}]} {
    %c0 = arith.constant 0 : index
    %c0_0 = arith.constant 0 : index
    %0 = vector.load %arg2[%c0, %c0_0] : memref<16x16xf32, #tpu.memory_space<vmem>>, vector<16x16xf32>
    %c0_1 = arith.constant 0 : index
    %c0_2 = arith.constant 0 : index
    %1 = vector.load %arg3[%c0_1, %c0_2] : memref<81x80xf32, #tpu.memory_space<vmem>>, vector<81x80xf32>
    %2 = vector.extract_strided_slice %1 {offsets = [0, 0], sizes = [16, 32], strides = [1, 1]} : vector<81x80xf32> to vector<16x32xf32>
    %3 = vector.extract_strided_slice %1 {offsets = [16, 32], sizes = [32, 32], strides = [1, 1]} : vector<81x80xf32> to vector<32x32xf32>
    %4 = vector.extract_strided_slice %1 {offsets = [48, 64], sizes = [32, 16], strides = [1, 1]} : vector<81x80xf32> to vector<32x16xf32>
    %5 = vector.extract_strided_slice %1 {offsets = [80, 0], sizes = [1, 80], strides = [1, 1]} : vector<81x80xf32> to vector<1x80xf32>
    %6 = vector.extract_strided_slice %5 {offsets = [0, 0], sizes = [1, 32], strides = [1, 1]} : vector<1x80xf32> to vector<1x32xf32>
    %7 = vector.extract_strided_slice %5 {offsets = [0, 32], sizes = [1, 32], strides = [1, 1]} : vector<1x80xf32> to vector<1x32xf32>
    %8 = vector.extract_strided_slice %5 {offsets = [0, 64], sizes = [1, 16], strides = [1, 1]} : vector<1x80xf32> to vector<1x16xf32>
    %c0_3 = arith.constant 0 : index
    %c0_4 = arith.constant 0 : index
    %9 = vector.load %arg1[%c0_3, %c0_4] : memref<16x16xf32, #tpu.memory_space<vmem>>, vector<16x16xf32>
    %cst = arith.constant dense<0.000000e+00> : vector<16x32xf32>
    %10 = tpu.matmul %9, %2, %cst {dimension_numbers = #tpu.dot_dimension_numbers<[1], [0], [0], [1], [0, 0, 1, 1], [], []>} : vector<16x16xf32>, vector<16x32xf32>, vector<16x32xf32> -> vector<16x32xf32>
    %cst_5 = arith.constant dense<0.000000e+00> : vector<16x32xf32>
    %11 = tpu.matmul %0, %10, %cst_5 {dimension_numbers = #tpu.dot_dimension_numbers<[1], [0], [0], [1], [0, 0, 1, 1], [], []>} : vector<16x16xf32>, vector<16x32xf32>, vector<16x32xf32> -> vector<16x32xf32>
    %12 = vector.broadcast %6 : vector<1x32xf32> to vector<16x32xf32>
    %13 = arith.addf %11, %12 : vector<16x32xf32>
    %cst_6 = arith.constant 0.000000e+00 : f32
    %14 = vector.broadcast %cst_6 : f32 to vector<16x32xf32>
    %15 = arith.maximumf %13, %14 : vector<16x32xf32>
    %cst_7 = arith.constant dense<0.000000e+00> : vector<16x32xf32>
    %16 = tpu.matmul %15, %3, %cst_7 {dimension_numbers = #tpu.dot_dimension_numbers<[1], [0], [0], [1], [0, 0, 1, 1], [], []>} : vector<16x32xf32>, vector<32x32xf32>, vector<16x32xf32> -> vector<16x32xf32>
    %cst_8 = arith.constant dense<0.000000e+00> : vector<16x32xf32>
    %17 = tpu.matmul %0, %16, %cst_8 {dimension_numbers = #tpu.dot_dimension_numbers<[1], [0], [0], [1], [0, 0, 1, 1], [], []>} : vector<16x16xf32>, vector<16x32xf32>, vector<16x32xf32> -> vector<16x32xf32>
    %18 = vector.broadcast %7 : vector<1x32xf32> to vector<16x32xf32>
    %19 = arith.addf %17, %18 : vector<16x32xf32>
    %cst_9 = arith.constant 0.000000e+00 : f32
    %20 = vector.broadcast %cst_9 : f32 to vector<16x32xf32>
    %21 = arith.maximumf %19, %20 : vector<16x32xf32>
    %cst_10 = arith.constant dense<0.000000e+00> : vector<16x16xf32>
    %22 = tpu.matmul %21, %4, %cst_10 {dimension_numbers = #tpu.dot_dimension_numbers<[1], [0], [0], [1], [0, 0, 1, 1], [], []>} : vector<16x32xf32>, vector<32x16xf32>, vector<16x16xf32> -> vector<16x16xf32>
    %cst_11 = arith.constant dense<0.000000e+00> : vector<16x16xf32>
    %23 = tpu.matmul %0, %22, %cst_11 {dimension_numbers = #tpu.dot_dimension_numbers<[1], [0], [0], [1], [0, 0, 1, 1], [], []>} : vector<16x16xf32>, vector<16x16xf32>, vector<16x16xf32> -> vector<16x16xf32>
    %24 = vector.broadcast %8 : vector<1x16xf32> to vector<16x16xf32>
    %25 = arith.addf %23, %24 : vector<16x16xf32>
    %cst_12 = arith.constant 0.000000e+00 : f32
    %26 = vector.broadcast %cst_12 : f32 to vector<16x16xf32>
    %27 = arith.maximumf %25, %26 : vector<16x16xf32>
    %c0_13 = arith.constant 0 : index
    %c0_14 = arith.constant 0 : index
    %28 = vector.load %arg4[%c0_13, %c0_14] : memref<16x16xf32, #tpu.memory_space<vmem>>, vector<16x16xf32>
    tpu.vector_store %arg4[%c0_13, %c0_14], %27 {strides = array<i32>} : memref<16x16xf32, #tpu.memory_space<vmem>>, vector<16x16xf32>,
    return
  }
  func.func @transform_0(%arg0: i32) -> (i32, i32) {
    %c0_i32 = arith.constant 0 : i32
    %c0_i32_0 = arith.constant 0 : i32
    return %arg0, %c0_i32 : i32, i32
  }
  func.func @transform_1(%arg0: i32) -> (i32, i32) {
    %c0_i32 = arith.constant 0 : i32
    %c0_i32_0 = arith.constant 0 : i32
    %c0_i32_1 = arith.constant 0 : i32
    return %c0_i32, %c0_i32_0 : i32, i32
  }
  func.func @transform_2(%arg0: i32) -> (i32, i32) {
    %c0_i32 = arith.constant 0 : i32
    %c0_i32_0 = arith.constant 0 : i32
    %c0_i32_1 = arith.constant 0 : i32
    return %c0_i32, %c0_i32_0 : i32, i32
  }
  func.func @transform_3(%arg0: i32) -> (i32, i32) {
    %c0_i32 = arith.constant 0 : i32
    %c0_i32_0 = arith.constant 0 : i32
    return %arg0, %c0_i32 : i32, i32
  }
}

</mosaic_0001>

<bundles_post_ra>
// kernel: tpu_custom_call.1
= control target key start
LH: loop header
LB: loop body
LE: loop exit
PB: predicated region body
PF: predicated region fallthrough
CT: control target
= control target key end

     0   :  { %vm30_vm0 = vcmask 130048   ;;  %s841_s0 = inlined_call_operand.vmem [shape: f32[16,16], index: 0, kind: input, shape index: {}]   ;;  %s842_s1 = inlined_call_operand.vmem [shape: f32[16,16], index: 1, kind: input, shape index: {}]   ;;  %s843_s2 = inlined_call_operand.vmem [shape: f32[81,80], index: 2, kind: input, shape index: {}]   ;;  %s844_s3 = inlined_call_operand.hbm [shape: f32[16,16], index: 3, kind: output, shape index: {}]  }
   0x1   :  { %v17_v0 = vld [vmem:[%s843_s2] sm:$0xff]  ;;  %v18_v1 = vld [vmem:[%s843_s2 + $0x8] sm:$0xff] }
   0x2   :  { %v28_v2 = vld [vmem:[%s841_s0] sm:$0xff]  ;;  %v664_v3 = vpack.c.bf16 %v18_v1, %v17_v0 }
   0x3   :  { %618 = vmatprep.mubr.msk.f32.mxu0 %vm30_vm0, %v28_v2 }
   0x4   :  { %8 = vsyncpa [#allocation3], 0  ;;  %665 = vmatprep.subr.bf16.mxu0 %v664_v3  ;;  %v29_v4 = vld [vmem:[%s841_s0 + $0x8] sm:$0xff]  ;;  %v15_v5 = vld [vmem:[%s842_s1] sm:$0xff]  ;;  %s745_s29 = smov 96   ;;  %vm215_vm1 = vcmask 261120  }
   0x5   :  { %667 = vmatpush3.bf16.msra.mxu0 %v664_v3  ;;  %625 = vmatprep.mubr.msk.f32.mxu1 %vm30_vm0, %v15_v5  ;;  %v19_v6 = vld [vmem:[%s843_s2 + $0x10] sm:$0xff]  ;;  %v20_v7 = vld [vmem:[%s843_s2 + $0x18] sm:$0xff]  ;;  %v21_v8 = vld [vmem:[%s843_s2 + $0x20] sm:$0xff]  ;;  %s746_s14 = smov 64  }
   0x6   :  { %v701_v9 = vpack.i.bf16 %v20_v7, %v19_v6  ;;  %v22_v10 = vld [vmem:[%s843_s2 + $0x28] sm:$0xff]  ;;  %v575_v24 = vld [vmem:[%s843_s2 + $0x50] ss:$0 sm:$0xff]  ;;  %v24_v32 = vld [vmem:[%s843_s2 + $0x38] sm:$0xff] }
   0x7   :  { %v706_v11 = vpack.i.bf16 %v22_v10, %v21_v8  ;;  %v16_v23 = vld [vmem:[%s842_s1 + $0x8] sm:$0xff]  ;;  %v23_v31 = vld [vmem:[%s843_s2 + $0x30] sm:$0xff]  ;;  %v25_v33 = vld [vmem:[%s843_s2 + $0x40] sm:$0xff] }
   0x8   :  { %619 = vmatmul.mubr.msk.f32.vlgmr.msra.gmra.mrb[0].mxu0 %vm30_vm0, %v29_v4  ;;  %702 = vrot.lane.b32.xlu0 %v701_v9, %s745_s29  ;;  %v711_v34 = vpack.i.bf16 %v24_v32, %v23_v31  ;;  %v26_v35 = vld [vmem:[%s843_s2 + $0x48] sm:$0xff]  ;;  %s747_s2 = smov [#allocation2]  }
   0x9   :  { %v716_v36 = vpack.i.bf16 %v26_v35, %v25_v33  ;;  %s562_s15 = sshll.u32 %s747_s2, 4  ;;  %s563_s15 = int_to_ptr.vmem [resolvable:$true] %s562_s15 }
   0xa   :  { %712 = vrot.lane.b32.xlu1 %v711_v34, %s746_s14  ;;  %s721_s16 = scalar_lea.vmem %s563_s15, 256  ;;  %p726_p1 = scmp.lt.s32.totalorder %s563_s15, %s563_s15 }
   0xb   :  { %p722_p0 = scmp.ne.s32.totalorder %s563_s15, %s721_s16  ;;  %p727_p2 = scmp.lt.s32.totalorder %s721_s16, %s721_s16 }
   0xc   :  { %707 = vrot.lane.b32.xlu0 %v706_v11, %s745_s29 }
   0xd   :  { %p728_p3 = por %p727_p2, %p726_p1 }
   0xe   :  { %717 = vrot.lane.b32.xlu1 %v716_v36, %s746_s14 }
   0xf   :  { %p729_p4 = pnand %p728_p3, %p722_p0 }
  0x10   :  { %298 = vrot.lane.b32.xlu0 %v575_v24, %s745_s29 }
  0x12   :  { %475 = vrot.lane.b32.xlu1 %v575_v24, %s746_s14 }
  0x7a   :  { %v703_v12 = vpop.permute.xlu0 %702 }
  0x7b   :  { %v705_v13 = vunpack.i.h.bf16 %v703_v12  ;;  %v704_v14 = vunpack.i.l.bf16 %v703_v12 }
  0x7c   :  { %v713_v37 = vpop.permute.xlu1 %712 }
  0x7d   :  { %v672_v16 = vpack.c.bf16 %v705_v13, %v704_v14  ;;  %v715_v38 = vunpack.i.h.bf16 %v713_v37  ;;  %v714_v39 = vunpack.i.l.bf16 %v713_v37 }
  0x7e   :  { %v708_v18 = vpop.permute.xlu0 %707 }
  0x7f   :  { %v710_v20 = vunpack.i.h.bf16 %v708_v18  ;;  %v709_v21 = vunpack.i.l.bf16 %v708_v18  ;;  %673 = vmatprep.subr.bf16.mxu0 %v672_v16  ;;  %v684_v44 = vpack.c.bf16 %v715_v38, %v714_v39 }
  0x80   :  { %675 = vmatpush3.bf16.msra.mxu0 %v672_v16  ;;  %v718_v42 = vpop.permute.xlu1 %717 }
  0x81   :  { %v676_v22 = vpack.c.bf16 %v710_v20, %v709_v21  ;;  %v720_v45 = vunpack.i.h.bf16 %v718_v42  ;;  %v719_v46 = vunpack.i.l.bf16 %v718_v42 }
  0x82   :  { %v299_v48 = vpop.permute.xlu0 %298 }
  0x83   :  { %677 = vmatprep.subr.bf16.mxu0 %v676_v22  ;;  %v688_v47 = vpack.c.bf16 %v720_v45, %v719_v46 }
  0x84   :  { %679 = vmatpush3.bf16.msra.mxu0 %v676_v22  ;;  %v476_v58 = vpop.permute.xlu1 %475 }
  0xdb   :  { %v620_v15 = vpop.f32.mrb[0].mxu0 }
  0xdc   :  { %v103_v17 = vpop.f32.mrb[1].mxu0 }
  0xdd   :  { %v668_v19 = vpack.c.bf16 %v620_v15, %v103_v17 }
  0xdf   :  { %669 = vmatprep.subr.bf16.mxu1 %v668_v19 }
  0xe0   :  { %671 = vmatpush3.bf16.msra.mxu1 %v668_v19 }
  0xe3   :  { %626 = vmatmul.mubr.msk.f32.vlgmr.msra.gmra.mrb[0].mxu1 %vm30_vm0, %v16_v23 }
  0xe4   :  { %643 = vmatprep.mubr.msk.f32.mxu1 %vm30_vm0, %v15_v5 }
 0x1b6   :  { %v627_v25 = vpop.f32.mrb[0].mxu1 }
 0x1b7   :  { %v194_v26 = vadd.f32 %v627_v25, %v575_v24  ;;  %v188_v27 = vpop.f32.mrb[1].mxu1 }
 0x1b8   :  { %v189_v28 = vadd.f32 %v575_v24, %v188_v27 }
 0x1b9   :  { %v198_v30 = vmax.f32 %v194_v26, 0.0 }
 0x1ba   :  { %v197_v29 = vmax.f32 %v189_v28, 0.0 }
 0x1bc   :  { %636 = vmatprep.mubr.msk.f32.mxu0 %vm215_vm1, %v197_v29 }
 0x1bd   :  { %637 = vmatmul.mubr.msk.f32.vlgmr.msra.gmra.mrb[2].mxu0 %vm215_vm1, %v198_v30 }
 0x1be   :  { %661 = vmatprep.mubr.msk.f32.mxu0 %vm30_vm0, %v15_v5 }
 0x290   :  { %v638_v40 = vpop.f32.mrb[2].mxu0 }
 0x291   :  { %v288_v41 = vpop.f32.mrb[3].mxu0 }
 0x292   :  { %v680_v43 = vpack.c.bf16 %v638_v40, %v288_v41 }
 0x294   :  { %681 = vmatprep.subr.bf16.mxu1 %v680_v43 }
 0x295   :  { %683 = vmatpush3.bf16.msra.mxu1 %v680_v43 }
 0x296   :  { %685 = vmatprep.subr.bf16.mxu1 %v684_v44 }
 0x298   :  { %644 = vmatmul.mubr.msk.f32.vlgmr.msra.gmra.mrb[2].mxu1 %vm30_vm0, %v16_v23 }
 0x299   :  { %687 = vmatpush3.bf16.msra.mxu1 %v684_v44 }
 0x29a   :  { %689 = vmatprep.subr.bf16.mxu1 %v688_v47 }
 0x29d   :  { %691 = vmatpush3.bf16.msra.mxu1 %v688_v47 }
 0x36b   :  { %v645_v49 = vpop.f32.mrb[2].mxu1 }
 0x36c   :  { %v373_v50 = vadd.f32 %v645_v49, %v299_v48  ;;  %v367_v51 = vpop.f32.mrb[3].mxu1 }
 0x36d   :  { %v368_v52 = vadd.f32 %v367_v51, %v299_v48 }
 0x36e   :  { %v377_v54 = vmax.f32 %v373_v50, 0.0 }
 0x36f   :  { %v376_v53 = vmax.f32 %v368_v52, 0.0 }
 0x371   :  { %654 = vmatprep.mubr.msk.f32.mxu1 %vm215_vm1, %v376_v53 }
 0x372   :  { %655 = vmatmul.mubr.msk.f32.vlgmr.msra.gmra.mrb[4].mxu1 %vm215_vm1, %v377_v54 }
 0x445   :  { %v656_v55 = vpop.f32.mrb[4].mxu1 }
 0x446   :  { %v466_v56 = vpop.f32.mrb[5].mxu1 }
 0x447   :  { %v692_v57 = vpack.c.bf16 %v656_v55, %v466_v56 }
 0x449   :  { %693 = vmatprep.subr.bf16.mxu0 %v692_v57 }
 0x44a   :  { %695 = vmatpush3.bf16.msra.mxu0 %v692_v57 }
 0x44d   :  { %662 = vmatmul.mubr.msk.f32.vlgmr.msra.gmra.mrb[4].mxu0 %vm30_vm0, %v16_v23 }
 0x520   :  { %v663_v59 = vpop.f32.mrb[4].mxu0 }
 0x521   :  { %v550_v60 = vadd.f32 %v663_v59, %v476_v58  ;;  %v544_v61 = vpop.f32.mrb[5].mxu0 }
 0x522   :  { %v545_v62 = vadd.f32 %v544_v61, %v476_v58 }
 0x523   :  { %v554_v63 = vmax.f32 %v550_v60, 0.0 }
 0x524   :  { %v553_v0 = vmax.f32 %v545_v62, 0.0 }
 0x525   :  { %556 = vst.msk [vmem:[#allocation2 + $0x8] sm:$0xff] %vm30_vm0, %v554_v63 }
 0x526   :  { %555 = vst.msk [vmem:[#allocation2] sm:$0xff] %vm30_vm0, %v553_v0 }
 0x527   :  { %732 = shalt.err (!%p729_p4)
}
 0x528   :  { %s733_s19 = scalar_lea.hbm %s844_s3, 256 }
 0x529   :  { %p734_p5 = scmp.ne.s32.totalorder %s844_s3, %s733_s19  ;;  %p737_p6 = scmp.lt.u32.totalorder %s733_s19, %s844_s3 }
 0x52b   :  { %p739_p7 = pnand %p737_p6, %p734_p5 }
 0x52d   :  { %742 = shalt.err (!%p739_p7)
}
 0x52e   :  { %s748_s24 = smov 128   ;;  %s749_s25 = smov 8  }
 0x52f   :  { %568 = dma.vmem_to_hbm [thread:$0]  %s563_s15, 256, %s844_s3, [#allocation3], %s748_s24, %s748_s24, %s749_s25  }
 0x530   :  { %743 = dma.done.wait [#allocation3], 256  }
 0x531   :  { %744 = vsyncadd [#allocation3], 4294967040 }
 0x532   :  { %572 = vsyncpa [#allocation3], 1 }

</bundles_post_ra>
